<compile_context>
chip_gen: v7x
topology: tpu7x:2x2x1
jax: 0.10.0
libtpu: 0.0.40
codegen_flags: <defaults>
</compile_context>

<pallas_src>
import functools

import jax
import jax.numpy as jnp
from jax.experimental import pallas as pl
from jax.experimental.pallas import tpu as pltpu

LN_EPS = 1e-5                 # PyTorch LayerNorm default
MXU_DTYPE = jnp.float32       # set to jnp.bfloat16 on v6e/v7x for ~2x MXU throughput
VMEM_LIMIT = 32 * 1024 * 1024


def _mm(a, b):
    """a @ b on the MXU with float32 accumulation."""
    return jnp.dot(a.astype(MXU_DTYPE), b.astype(MXU_DTYPE),
                   preferred_element_type=jnp.float32)


def _mm_nt(a, b):
    """a @ b.T (contract the last dims) without materializing the transpose."""
    return jax.lax.dot_general(a.astype(MXU_DTYPE), b.astype(MXU_DTYPE),
                               (((1,), (1,)), ((), ())),
                               preferred_element_type=jnp.float32)


def _layernorm(z, gamma, beta):
    mu = jnp.mean(z, axis=-1, keepdims=True)
    var = jnp.mean(jnp.square(z - mu), axis=-1, keepdims=True)
    return (z - mu) * jax.lax.rsqrt(var + LN_EPS) * gamma + beta


# --------------------------------------------------------------------------
# Upsample(x2, linear, align_corners=False) along the feature axis + pos_embed
# --------------------------------------------------------------------------
def up_pos_kernel(x_ref, pos_ref, out_ref):
    # x_ref: (1, S, L);  pos_ref: (2, S, L) even/odd planes;  out_ref: (1, 2, S, L)
    x = x_ref[0]                                               # (S, L)
    x_prev = jnp.concatenate([x[:, :1], x[:, :-1]], axis=1)    # x[j-1], clamped at 0
    x_next = jnp.concatenate([x[:, 1:], x[:, -1:]], axis=1)    # x[j+1], clamped at L-1
    # out[2j]   = 0.75*x[j] + 0.25*x[j-1]   (align_corners=False, scale 2)
    # out[2j+1] = 0.75*x[j] + 0.25*x[j+1]
    out_ref[0, 0] = 0.75 * x + 0.25 * x_prev + pos_ref[0]
    out_ref[0, 1] = 0.75 * x + 0.25 * x_next + pos_ref[1]


def upsample2x_add_pos(x, pos_embed):
    """x: (B, S, L) -> (B, S, 2L) upsampled along the last axis, plus pos_embed (1,S,2L)."""
    B, S, L = x.shape
    D = 2 * L
    # host-side layout plumbing: split pos_embed into even/odd feature planes (2, S, L)
    pos_planes = jnp.transpose(pos_embed.reshape(S, L, 2), (2, 0, 1))
    planes = pl.pallas_call(
        up_pos_kernel,
        grid=(B,),
        in_specs=[
            pl.BlockSpec((1, S, L), lambda b: (b, 0, 0)),
            pl.BlockSpec((2, S, L), lambda b: (0, 0, 0)),
        ],
        out_specs=pl.BlockSpec((1, 2, S, L), lambda b: (b, 0, 0, 0)),
        out_shape=jax.ShapeDtypeStruct((B, 2, S, L), jnp.float32),
        compiler_params=pltpu.CompilerParams(
            dimension_semantics=("parallel",),
            vmem_limit_bytes=VMEM_LIMIT),
    )(x, pos_planes)
    # interleave the even/odd planes back onto the feature axis (wrapper-side plumbing)
    return jnp.transpose(planes, (0, 2, 3, 1)).reshape(B, S, D)


# --------------------------------------------------------------------------
# TransformerBlock: x = LN1(x + MHSA(x)); x = LN2(x + MLP(x))   (mlp_depth=2)
# --------------------------------------------------------------------------
def transformer_block_kernel(x_ref, wq_ref, wk_ref, wv_ref, wo_ref, bo_ref,
                             g1_ref, b1_ref, wm1_ref, bm1_ref, a_ref,
                             wm2_ref, bm2_ref, g2_ref, b2_ref, out_ref,
                             *, num_heads, scale):
    x = x_ref[0]                                   # (S, D)
    d = x.shape[-1]
    hd = d // num_heads

    # ---- multi-head self-attention ----
    q = _mm(x, wq_ref[...]) * scale                # (S, D)
    k = _mm(x, wk_ref[...])
    v = _mm(x, wv_ref[...])
    heads = []
    for h in range(num_heads):                     # static, small head count
        lo = h * hd
        qh = q[:, lo:lo + hd]
        kh = k[:, lo:lo + hd]
        vh = v[:, lo:lo + hd]
        s = _mm_nt(qh, kh)                         # (S, S)
        s = s - jnp.max(s, axis=-1, keepdims=True)
        e = jnp.exp(s)
        p = e / jnp.sum(e, axis=-1, keepdims=True)
        heads.append(_mm(p, vh))                   # (S, hd)
    attn = jnp.concatenate(heads, axis=-1)         # (S, D)
    attn = _mm(attn, wo_ref[...]) + bo_ref[...]    # output projection (with bias)

    y = _layernorm(x + attn, g1_ref[...], b1_ref[...])

    # ---- MLP (mlp_depth=2): Linear -> Dropout -> PReLU -> Linear -> Dropout ----
    # TODO(synk): Dropout(p=0.1) is applied as identity (eval-mode forward).
    m = _mm(y, wm1_ref[...]) + bm1_ref[...]
    m = jnp.where(m >= 0, m, a_ref[...] * m)       # PReLU (single shared slope)
    m = _mm(m, wm2_ref[...]) + bm2_ref[...]

    out_ref[0] = _layernorm(y + m, g2_ref[...], b2_ref[...])


def transformer_block(x, p, num_heads):
    """One post-norm TransformerBlock. x: (B, S, D)."""
    B, S, D = x.shape
    assert D % num_heads == 0, "dim % num_heads != 0"
    scale = (D // num_heads) ** -0.5
    args = (x, p["wq"], p["wk"], p["wv"], p["wo"], p["bo"],
            p["g1"], p["b1"], p["wm1"], p["bm1"], p["a"],
            p["wm2"], p["bm2"], p["g2"], p["b2"])
    in_specs = [pl.BlockSpec((1, S, D), lambda b: (b, 0, 0))]
    in_specs += [pl.BlockSpec(arr.shape, lambda b, n=arr.ndim: (0,) * n)
                 for arr in args[1:]]
    kern = functools.partial(transformer_block_kernel,
                             num_heads=num_heads, scale=scale)
    return pl.pallas_call(
        kern,
        grid=(B,),
        in_specs=in_specs,
        out_specs=pl.BlockSpec((1, S, D), lambda b: (b, 0, 0)),
        out_shape=jax.ShapeDtypeStruct((B, S, D), jnp.float32),
        compiler_params=pltpu.CompilerParams(
            dimension_semantics=("parallel",),
            vmem_limit_bytes=VMEM_LIMIT),
    )(*args)


# --------------------------------------------------------------------------
# TransformerDecoder forward
# --------------------------------------------------------------------------
def transformer_decoder_forward(x, in_block_params, up_blocks_params):
    """in_block_params: None or (block_params, num_heads).
       up_blocks_params: list of dicts {pos_embed, num_heads, blocks=[block_params, ...]}."""
    if in_block_params is not None:
        blk, heads = in_block_params
        x = transformer_block(x, blk, heads)
    for up in up_blocks_params:
        x = upsample2x_add_pos(x, up["pos_embed"])
        for blk in up["blocks"]:
            x = transformer_block(x, blk, up["num_heads"])
        # TODO(synk): with_outro=True per-head outro Linears not implemented (the demo
        #             uses the default with_outro=False; the PyTorch reference stores
        #             them in a plain Python list, so they are not real submodules).
    return x


# --------------------------------------------------------------------------
# Deterministic synthetic parameters (weights stored (in, out) so kernels do x @ W)
# --------------------------------------------------------------------------
def make_transformer_block_params(key, dim, mlp_ratio):
    hidden = dim * mlp_ratio
    ks = jax.random.split(key, 8)
    s_in = dim ** -0.5
    return dict(
        wq=jax.random.normal(ks[0], (dim, dim), jnp.float32) * s_in,
        wk=jax.random.normal(ks[1], (dim, dim), jnp.float32) * s_in,
        wv=jax.random.normal(ks[2], (dim, dim), jnp.float32) * s_in,
        wo=jax.random.normal(ks[3], (dim, dim), jnp.float32) * s_in,
        bo=jnp.zeros((1, dim), jnp.float32),
        g1=jnp.ones((1, dim), jnp.float32),
        b1=jnp.zeros((1, dim), jnp.float32),
        wm1=jax.random.normal(ks[4], (dim, hidden), jnp.float32) * s_in,
        bm1=jax.random.normal(ks[5], (1, hidden), jnp.float32) * 0.01,
        a=jnp.full((1, 1), 0.25, jnp.float32),          # PReLU default slope
        wm2=jax.random.normal(ks[6], (hidden, dim), jnp.float32) * hidden ** -0.5,
        bm2=jax.random.normal(ks[7], (1, dim), jnp.float32) * 0.01,
        g2=jnp.ones((1, dim), jnp.float32),
        b2=jnp.zeros((1, dim), jnp.float32),
    )


if __name__ == "__main__":
    # TransformerDecoder(
    #   in_block_config=dict(dim=64, num_heads=2, mlp_ratio=4, mlp_depth=2),
    #   up_blocks_config=[dict(input_dim=64, seq_length=8, num_heads=2, depth=1,
    #                          mlp_ratio=4, mlp_depth=2, bilinear=True, with_outro=False)])
    B, S = 2, 8
    in_dim, num_heads, mlp_ratio = 64, 2, 4
    up_dim = 2 * in_dim

    key = jax.random.PRNGKey(0)
    k_in, k_pos, k_blk, k_x = jax.random.split(key, 4)

    in_block = (make_transformer_block_params(k_in, in_dim, mlp_ratio), num_heads)
    up_block = dict(
        pos_embed=jax.random.normal(k_pos, (1, S, up_dim), jnp.float32) * 0.02,
        num_heads=num_heads,
        blocks=[make_transformer_block_params(k_blk, up_dim, mlp_ratio)],
    )

    x = jax.random.normal(k_x, (B, S, in_dim), jnp.float32)

    out = transformer_decoder_forward(x, in_block, [up_block])
    out = jax.block_until_ready(out)

    assert out.shape == (B, S, up_dim), out.shape
    assert bool(jnp.all(jnp.isfinite(out)))
    print("KERNEL_OK")
</pallas_src>

<mosaic_0001>
module attributes {stable_mosaic.version = 11 : i64} {
  func.func @transformer_block_kernel(%arg0: i32, %arg1: memref<1x8x64xf32, #tpu.memory_space<vmem>>, %arg2: memref<64x64xf32, #tpu.memory_space<vmem>>, %arg3: memref<64x64xf32, #tpu.memory_space<vmem>>, %arg4: memref<64x64xf32, #tpu.memory_space<vmem>>, %arg5: memref<64x64xf32, #tpu.memory_space<vmem>>, %arg6: memref<1x64xf32, #tpu.memory_space<vmem>>, %arg7: memref<1x64xf32, #tpu.memory_space<vmem>>, %arg8: memref<1x64xf32, #tpu.memory_space<vmem>>, %arg9: memref<64x256xf32, #tpu.memory_space<vmem>>, %arg10: memref<1x256xf32, #tpu.memory_space<vmem>>, %arg11: memref<1x1xf32, #tpu.memory_space<vmem>>, %arg12: memref<256x64xf32, #tpu.memory_space<vmem>>, %arg13: memref<1x64xf32, #tpu.memory_space<vmem>>, %arg14: memref<1x64xf32, #tpu.memory_space<vmem>>, %arg15: memref<1x64xf32, #tpu.memory_space<vmem>>, %arg16: memref<1x8x64xf32, #tpu.memory_space<vmem>>) attributes {dimension_semantics = [#tpu.dimension_semantics<parallel>], iteration_bounds = array<i64: 2>, scalar_prefetch = 0 : i64, scratch_operands = 0 : i64, tpu.core_type = #tpu.core_type<tc>, window_params = [{transform_indices = @transform_0, window_bounds = array<i64: 1, 8, 64>}, {pipeline_mode = #tpu.pipeline_mode<synchronous>, transform_indices = @transform_1, window_bounds = array<i64: 64, 64>}, {pipeline_mode = #tpu.pipeline_mode<synchronous>, transform_indices = @transform_2, window_bounds = array<i64: 64, 64>}, {pipeline_mode = #tpu.pipeline_mode<synchronous>, transform_indices = @transform_3, window_bounds = array<i64: 64, 64>}, {pipeline_mode = #tpu.pipeline_mode<synchronous>, transform_indices = @transform_4, window_bounds = array<i64: 64, 64>}, {pipeline_mode = #tpu.pipeline_mode<synchronous>, transform_indices = @transform_5, window_bounds = array<i64: 1, 64>}, {pipeline_mode = #tpu.pipeline_mode<synchronous>, transform_indices = @transform_6, window_bounds = array<i64: 1, 64>}, {pipeline_mode = #tpu.pipeline_mode<synchronous>, transform_indices = @transform_7, window_bounds = array<i64: 1, 64>}, {pipeline_mode = #tpu.pipeline_mode<synchronous>, transform_indices = @transform_8, window_bounds = array<i64: 64, 256>}, {pipeline_mode = #tpu.pipeline_mode<synchronous>, transform_indices = @transform_9, window_bounds = array<i64: 1, 256>}, {pipeline_mode = #tpu.pipeline_mode<synchronous>, transform_indices = @transform_10, window_bounds = array<i64: 1, 1>}, {pipeline_mode = #tpu.pipeline_mode<synchronous>, transform_indices = @transform_11, window_bounds = array<i64: 256, 64>}, {pipeline_mode = #tpu.pipeline_mode<synchronous>, transform_indices = @transform_12, window_bounds = array<i64: 1, 64>}, {pipeline_mode = #tpu.pipeline_mode<synchronous>, transform_indices = @transform_13, window_bounds = array<i64: 1, 64>}, {pipeline_mode = #tpu.pipeline_mode<synchronous>, transform_indices = @transform_14, window_bounds = array<i64: 1, 64>}, {transform_indices = @transform_15, window_bounds = array<i64: 1, 8, 64>}]} {
    %c0 = arith.constant 0 : index
    %c0_0 = arith.constant 0 : index
    %c0_1 = arith.constant 0 : index
    %0 = vector.load %arg1[%c0, %c0_0, %c0_1] : memref<1x8x64xf32, #tpu.memory_space<vmem>>, vector<1x8x64xf32>
    %1 = vector.shape_cast %0 : vector<1x8x64xf32> to vector<8x64xf32>
    %c0_2 = arith.constant 0 : index
    %c0_3 = arith.constant 0 : index
    %2 = vector.load %arg2[%c0_2, %c0_3] : memref<64x64xf32, #tpu.memory_space<vmem>>, vector<64x64xf32>
    %cst = arith.constant dense<0.000000e+00> : vector<8x64xf32>
    %3 = tpu.matmul %1, %2, %cst {dimension_numbers = #tpu.dot_dimension_numbers<[1], [0], [0], [1], [0, 0, 1, 1], [], []>} : vector<8x64xf32>, vector<64x64xf32>, vector<8x64xf32> -> vector<8x64xf32>
    %cst_4 = arith.constant 0.176776692 : f32
    %4 = vector.broadcast %cst_4 : f32 to vector<8x64xf32>
    %5 = arith.mulf %3, %4 : vector<8x64xf32>
    %c0_5 = arith.constant 0 : index
    %c0_6 = arith.constant 0 : index
    %6 = vector.load %arg3[%c0_5, %c0_6] : memref<64x64xf32, #tpu.memory_space<vmem>>, vector<64x64xf32>
    %cst_7 = arith.constant dense<0.000000e+00> : vector<8x64xf32>
    %7 = tpu.matmul %1, %6, %cst_7 {dimension_numbers = #tpu.dot_dimension_numbers<[1], [0], [0], [1], [0, 0, 1, 1], [], []>} : vector<8x64xf32>, vector<64x64xf32>, vector<8x64xf32> -> vector<8x64xf32>
    %c0_8 = arith.constant 0 : index
    %c0_9 = arith.constant 0 : index
    %8 = vector.load %arg4[%c0_8, %c0_9] : memref<64x64xf32, #tpu.memory_space<vmem>>, vector<64x64xf32>
    %cst_10 = arith.constant dense<0.000000e+00> : vector<8x64xf32>
    %9 = tpu.matmul %1, %8, %cst_10 {dimension_numbers = #tpu.dot_dimension_numbers<[1], [0], [0], [1], [0, 0, 1, 1], [], []>} : vector<8x64xf32>, vector<64x64xf32>, vector<8x64xf32> -> vector<8x64xf32>
    %10 = vector.extract_strided_slice %5 {offsets = [0, 0], sizes = [8, 32], strides = [1, 1]} : vector<8x64xf32> to vector<8x32xf32>
    %11 = vector.extract_strided_slice %7 {offsets = [0, 0], sizes = [8, 32], strides = [1, 1]} : vector<8x64xf32> to vector<8x32xf32>
    %12 = vector.extract_strided_slice %9 {offsets = [0, 0], sizes = [8, 32], strides = [1, 1]} : vector<8x64xf32> to vector<8x32xf32>
    %cst_11 = arith.constant dense<0.000000e+00> : vector<8x8xf32>
    %13 = tpu.matmul %10, %11, %cst_11 {dimension_numbers = #tpu.dot_dimension_numbers<[1], [1], [0], [0], [0, 0, 1, 0], [], []>} : vector<8x32xf32>, vector<8x32xf32>, vector<8x8xf32> -> vector<8x8xf32>
    %cst_12 = arith.constant dense<0xFF800000> : vector<8xf32>
    %14 = vector.multi_reduction <maximumf>, %13, %cst_12 [1] : vector<8x8xf32> to vector<8xf32>
    %15 = vector.shape_cast %14 : vector<8xf32> to vector<8x1xf32>
    %16 = vector.broadcast %15 : vector<8x1xf32> to vector<8x8xf32>
    %17 = arith.subf %13, %16 : vector<8x8xf32>
    %18 = math.exp %17 : vector<8x8xf32>
    %cst_13 = arith.constant dense<0.000000e+00> : vector<8xf32>
    %19 = vector.multi_reduction <add>, %18, %cst_13 [1] : vector<8x8xf32> to vector<8xf32>
    %20 = vector.shape_cast %19 : vector<8xf32> to vector<8x1xf32>
    %21 = vector.broadcast %20 : vector<8x1xf32> to vector<8x8xf32>
    %22 = arith.divf %18, %21 : vector<8x8xf32>
    %cst_14 = arith.constant dense<0.000000e+00> : vector<8x32xf32>
    %23 = tpu.matmul %22, %12, %cst_14 {dimension_numbers = #tpu.dot_dimension_numbers<[1], [0], [0], [1], [0, 0, 1, 1], [], []>} : vector<8x8xf32>, vector<8x32xf32>, vector<8x32xf32> -> vector<8x32xf32>
    %24 = vector.extract_strided_slice %5 {offsets = [0, 32], sizes = [8, 32], strides = [1, 1]} : vector<8x64xf32> to vector<8x32xf32>
    %25 = vector.extract_strided_slice %7 {offsets = [0, 32], sizes = [8, 32], strides = [1, 1]} : vector<8x64xf32> to vector<8x32xf32>
    %26 = vector.extract_strided_slice %9 {offsets = [0, 32], sizes = [8, 32], strides = [1, 1]} : vector<8x64xf32> to vector<8x32xf32>
    %cst_15 = arith.constant dense<0.000000e+00> : vector<8x8xf32>
    %27 = tpu.matmul %24, %25, %cst_15 {dimension_numbers = #tpu.dot_dimension_numbers<[1], [1], [0], [0], [0, 0, 1, 0], [], []>} : vector<8x32xf32>, vector<8x32xf32>, vector<8x8xf32> -> vector<8x8xf32>
    %cst_16 = arith.constant dense<0xFF800000> : vector<8xf32>
    %28 = vector.multi_reduction <maximumf>, %27, %cst_16 [1] : vector<8x8xf32> to vector<8xf32>
    %29 = vector.shape_cast %28 : vector<8xf32> to vector<8x1xf32>
    %30 = vector.broadcast %29 : vector<8x1xf32> to vector<8x8xf32>
    %31 = arith.subf %27, %30 : vector<8x8xf32>
    %32 = math.exp %31 : vector<8x8xf32>
    %cst_17 = arith.constant dense<0.000000e+00> : vector<8xf32>
    %33 = vector.multi_reduction <add>, %32, %cst_17 [1] : vector<8x8xf32> to vector<8xf32>
    %34 = vector.shape_cast %33 : vector<8xf32> to vector<8x1xf32>
    %35 = vector.broadcast %34 : vector<8x1xf32> to vector<8x8xf32>
    %36 = arith.divf %32, %35 : vector<8x8xf32>
    %cst_18 = arith.constant dense<0.000000e+00> : vector<8x32xf32>
    %37 = tpu.matmul %36, %26, %cst_18 {dimension_numbers = #tpu.dot_dimension_numbers<[1], [0], [0], [1], [0, 0, 1, 1], [], []>} : vector<8x8xf32>, vector<8x32xf32>, vector<8x32xf32> -> vector<8x32xf32>
    %38 = tpu.concatenate %23, %37 in 1 : vector<8x32xf32>, vector<8x32xf32> -> vector<8x64xf32>
    %c0_19 = arith.constant 0 : index
    %c0_20 = arith.constant 0 : index
    %39 = vector.load %arg5[%c0_19, %c0_20] : memref<64x64xf32, #tpu.memory_space<vmem>>, vector<64x64xf32>
    %cst_21 = arith.constant dense<0.000000e+00> : vector<8x64xf32>
    %40 = tpu.matmul %38, %39, %cst_21 {dimension_numbers = #tpu.dot_dimension_numbers<[1], [0], [0], [1], [0, 0, 1, 1], [], []>} : vector<8x64xf32>, vector<64x64xf32>, vector<8x64xf32> -> vector<8x64xf32>
    %c0_22 = arith.constant 0 : index
    %c0_23 = arith.constant 0 : index
    %41 = vector.load %arg6[%c0_22, %c0_23] : memref<1x64xf32, #tpu.memory_space<vmem>>, vector<1x64xf32>
    %42 = vector.broadcast %41 : vector<1x64xf32> to vector<8x64xf32>
    %43 = arith.addf %40, %42 : vector<8x64xf32>
    %44 = arith.addf %1, %43 : vector<8x64xf32>
    %c0_24 = arith.constant 0 : index
    %c0_25 = arith.constant 0 : index
    %45 = vector.load %arg7[%c0_24, %c0_25] : memref<1x64xf32, #tpu.memory_space<vmem>>, vector<1x64xf32>
    %c0_26 = arith.constant 0 : index
    %c0_27 = arith.constant 0 : index
    %46 = vector.load %arg8[%c0_26, %c0_27] : memref<1x64xf32, #tpu.memory_space<vmem>>, vector<1x64xf32>
    %cst_28 = arith.constant dense<0.000000e+00> : vector<8xf32>
    %47 = vector.multi_reduction <add>, %44, %cst_28 [1] : vector<8x64xf32> to vector<8xf32>
    %48 = vector.shape_cast %47 : vector<8xf32> to vector<8x1xf32>
    %cst_29 = arith.constant 6.400000e+01 : f32
    %49 = vector.broadcast %cst_29 : f32 to vector<8x1xf32>
    %50 = arith.divf %48, %49 : vector<8x1xf32>
    %51 = vector.broadcast %50 : vector<8x1xf32> to vector<8x64xf32>
    %52 = arith.subf %44, %51 : vector<8x64xf32>
    %53 = arith.mulf %52, %52 : vector<8x64xf32>
    %cst_30 = arith.constant dense<0.000000e+00> : vector<8xf32>
    %54 = vector.multi_reduction <add>, %53, %cst_30 [1] : vector<8x64xf32> to vector<8xf32>
    %55 = vector.shape_cast %54 : vector<8xf32> to vector<8x1xf32>
    %cst_31 = arith.constant 6.400000e+01 : f32
    %56 = vector.broadcast %cst_31 : f32 to vector<8x1xf32>
    %57 = arith.divf %55, %56 : vector<8x1xf32>
    %58 = vector.broadcast %50 : vector<8x1xf32> to vector<8x64xf32>
    %59 = arith.subf %44, %58 : vector<8x64xf32>
    %cst_32 = arith.constant 9.99999974E-6 : f32
    %60 = vector.broadcast %cst_32 : f32 to vector<8x1xf32>
    %61 = arith.addf %57, %60 : vector<8x1xf32>
    %62 = math.rsqrt %61 : vector<8x1xf32>
    %63 = vector.broadcast %62 : vector<8x1xf32> to vector<8x64xf32>
    %64 = arith.mulf %59, %63 : vector<8x64xf32>
    %65 = vector.broadcast %45 : vector<1x64xf32> to vector<8x64xf32>
    %66 = arith.mulf %64, %65 : vector<8x64xf32>
    %67 = vector.broadcast %46 : vector<1x64xf32> to vector<8x64xf32>
    %68 = arith.addf %66, %67 : vector<8x64xf32>
    %c0_33 = arith.constant 0 : index
    %c0_34 = arith.constant 0 : index
    %69 = vector.load %arg9[%c0_33, %c0_34] : memref<64x256xf32, #tpu.memory_space<vmem>>, vector<64x256xf32>
    %cst_35 = arith.constant dense<0.000000e+00> : vector<8x256xf32>
    %70 = tpu.matmul %68, %69, %cst_35 {dimension_numbers = #tpu.dot_dimension_numbers<[1], [0], [0], [1], [0, 0, 1, 1], [], []>} : vector<8x64xf32>, vector<64x256xf32>, vector<8x256xf32> -> vector<8x256xf32>
    %c0_36 = arith.constant 0 : index
    %c0_37 = arith.constant 0 : index
    %71 = vector.load %arg10[%c0_36, %c0_37] : memref<1x256xf32, #tpu.memory_space<vmem>>, vector<1x256xf32>
    %72 = vector.broadcast %71 : vector<1x256xf32> to vector<8x256xf32>
    %73 = arith.addf %70, %72 : vector<8x256xf32>
    %cst_38 = arith.constant 0.000000e+00 : f32
    %74 = vector.broadcast %cst_38 : f32 to vector<8x256xf32>
    %75 = arith.cmpf oge, %73, %74 : vector<8x256xf32>
    %c0_39 = arith.constant 0 : index
    %c0_40 = arith.constant 0 : index
    %76 = vector.load %arg11[%c0_39, %c0_40] : memref<1x1xf32, #tpu.memory_space<vmem>>, vector<1x1xf32>
    %77 = vector.broadcast %76 : vector<1x1xf32> to vector<8x256xf32>
    %78 = arith.mulf %77, %73 : vector<8x256xf32>
    %79 = arith.select %75, %73, %78 : vector<8x256xi1>, vector<8x256xf32>
    %c0_41 = arith.constant 0 : index
    %c0_42 = arith.constant 0 : index
    %80 = vector.load %arg12[%c0_41, %c0_42] : memref<256x64xf32, #tpu.memory_space<vmem>>, vector<256x64xf32>
    %cst_43 = arith.constant dense<0.000000e+00> : vector<8x64xf32>
    %81 = tpu.matmul %79, %80, %cst_43 {dimension_numbers = #tpu.dot_dimension_numbers<[1], [0], [0], [1], [0, 0, 1, 1], [], []>} : vector<8x256xf32>, vector<256x64xf32>, vector<8x64xf32> -> vector<8x64xf32>
    %c0_44 = arith.constant 0 : index
    %c0_45 = arith.constant 0 : index
    %82 = vector.load %arg13[%c0_44, %c0_45] : memref<1x64xf32, #tpu.memory_space<vmem>>, vector<1x64xf32>
    %83 = vector.broadcast %82 : vector<1x64xf32> to vector<8x64xf32>
    %84 = arith.addf %81, %83 : vector<8x64xf32>
    %85 = arith.addf %68, %84 : vector<8x64xf32>
    %c0_46 = arith.constant 0 : index
    %c0_47 = arith.constant 0 : index
    %86 = vector.load %arg14[%c0_46, %c0_47] : memref<1x64xf32, #tpu.memory_space<vmem>>, vector<1x64xf32>
    %c0_48 = arith.constant 0 : index
    %c0_49 = arith.constant 0 : index
    %87 = vector.load %arg15[%c0_48, %c0_49] : memref<1x64xf32, #tpu.memory_space<vmem>>, vector<1x64xf32>
    %cst_50 = arith.constant dense<0.000000e+00> : vector<8xf32>
    %88 = vector.multi_reduction <add>, %85, %cst_50 [1] : vector<8x64xf32> to vector<8xf32>
    %89 = vector.shape_cast %88 : vector<8xf32> to vector<8x1xf32>
    %cst_51 = arith.constant 6.400000e+01 : f32
    %90 = vector.broadcast %cst_51 : f32 to vector<8x1xf32>
    %91 = arith.divf %89, %90 : vector<8x1xf32>
    %92 = vector.broadcast %91 : vector<8x1xf32> to vector<8x64xf32>
    %93 = arith.subf %85, %92 : vector<8x64xf32>
    %94 = arith.mulf %93, %93 : vector<8x64xf32>
    %cst_52 = arith.constant dense<0.000000e+00> : vector<8xf32>
    %95 = vector.multi_reduction <add>, %94, %cst_52 [1] : vector<8x64xf32> to vector<8xf32>
    %96 = vector.shape_cast %95 : vector<8xf32> to vector<8x1xf32>
    %cst_53 = arith.constant 6.400000e+01 : f32
    %97 = vector.broadcast %cst_53 : f32 to vector<8x1xf32>
    %98 = arith.divf %96, %97 : vector<8x1xf32>
    %99 = vector.broadcast %91 : vector<8x1xf32> to vector<8x64xf32>
    %100 = arith.subf %85, %99 : vector<8x64xf32>
    %cst_54 = arith.constant 9.99999974E-6 : f32
    %101 = vector.broadcast %cst_54 : f32 to vector<8x1xf32>
    %102 = arith.addf %98, %101 : vector<8x1xf32>
    %103 = math.rsqrt %102 : vector<8x1xf32>
    %104 = vector.broadcast %103 : vector<8x1xf32> to vector<8x64xf32>
    %105 = arith.mulf %100, %104 : vector<8x64xf32>
    %106 = vector.broadcast %86 : vector<1x64xf32> to vector<8x64xf32>
    %107 = arith.mulf %105, %106 : vector<8x64xf32>
    %108 = vector.broadcast %87 : vector<1x64xf32> to vector<8x64xf32>
    %109 = arith.addf %107, %108 : vector<8x64xf32>
    %c0_55 = arith.constant 0 : index
    %c0_56 = arith.constant 0 : index
    %c0_57 = arith.constant 0 : index
    %110 = vector.load %arg16[%c0_55, %c0_56, %c0_57] : memref<1x8x64xf32, #tpu.memory_space<vmem>>, vector<1x8x64xf32>
    %111 = vector.shape_cast %110 : vector<1x8x64xf32> to vector<8x64xf32>
    %112 = vector.shape_cast %109 : vector<8x64xf32> to vector<1x8x64xf32>
    tpu.vector_store %arg16[%c0_55, %c0_56, %c0_57], %112 {strides = array<i32>} : memref<1x8x64xf32, #tpu.memory_space<vmem>>, vector<1x8x64xf32>,
    return
  }
  func.func @transform_0(%arg0: i32) -> (i32, i32, i32) {
    %c0_i32 = arith.constant 0 : i32
    %c0_i32_0 = arith.constant 0 : i32
    %c0_i32_1 = arith.constant 0 : i32
    return %arg0, %c0_i32, %c0_i32_0 : i32, i32, i32
  }
  func.func @transform_1(%arg0: i32) -> (i32, i32) {
    %c0_i32 = arith.constant 0 : i32
    %c0_i32_0 = arith.constant 0 : i32
    %c0_i32_1 = arith.constant 0 : i32
    return %c0_i32, %c0_i32_0 : i32, i32
  }
  func.func @transform_2(%arg0: i32) -> (i32, i32) {
    %c0_i32 = arith.constant 0 : i32
    %c0_i32_0 = arith.constant 0 : i32
    %c0_i32_1 = arith.constant 0 : i32
    return %c0_i32, %c0_i32_0 : i32, i32
  }
  func.func @transform_3(%arg0: i32) -> (i32, i32) {
    %c0_i32 = arith.constant 0 : i32
    %c0_i32_0 = arith.constant 0 : i32
    %c0_i32_1 = arith.constant 0 : i32
    return %c0_i32, %c0_i32_0 : i32, i32
  }
  func.func @transform_4(%arg0: i32) -> (i32, i32) {
    %c0_i32 = arith.constant 0 : i32
    %c0_i32_0 = arith.constant 0 : i32
    %c0_i32_1 = arith.constant 0 : i32
    return %c0_i32, %c0_i32_0 : i32, i32
  }
  func.func @transform_5(%arg0: i32) -> (i32, i32) {
    %c0_i32 = arith.constant 0 : i32
    %c0_i32_0 = arith.constant 0 : i32
    %c0_i32_1 = arith.constant 0 : i32
    return %c0_i32, %c0_i32_0 : i32, i32
  }
  func.func @transform_6(%arg0: i32) -> (i32, i32) {
    %c0_i32 = arith.constant 0 : i32
    %c0_i32_0 = arith.constant 0 : i32
    %c0_i32_1 = arith.constant 0 : i32
    return %c0_i32, %c0_i32_0 : i32, i32
  }
  func.func @transform_7(%arg0: i32) -> (i32, i32) {
    %c0_i32 = arith.constant 0 : i32
    %c0_i32_0 = arith.constant 0 : i32
    %c0_i32_1 = arith.constant 0 : i32
    return %c0_i32, %c0_i32_0 : i32, i32
  }
  func.func @transform_8(%arg0: i32) -> (i32, i32) {
    %c0_i32 = arith.constant 0 : i32
    %c0_i32_0 = arith.constant 0 : i32
    %c0_i32_1 = arith.constant 0 : i32
    return %c0_i32, %c0_i32_0 : i32, i32
  }
  func.func @transform_9(%arg0: i32) -> (i32, i32) {
    %c0_i32 = arith.constant 0 : i32
    %c0_i32_0 = arith.constant 0 : i32
    %c0_i32_1 = arith.constant 0 : i32
    return %c0_i32, %c0_i32_0 : i32, i32
  }
  func.func @transform_10(%arg0: i32) -> (i32, i32) {
    %c0_i32 = arith.constant 0 : i32
    %c0_i32_0 = arith.constant 0 : i32
    %c0_i32_1 = arith.constant 0 : i32
    return %c0_i32, %c0_i32_0 : i32, i32
  }
  func.func @transform_11(%arg0: i32) -> (i32, i32) {
    %c0_i32 = arith.constant 0 : i32
    %c0_i32_0 = arith.constant 0 : i32
    %c0_i32_1 = arith.constant 0 : i32
    return %c0_i32, %c0_i32_0 : i32, i32
  }
  func.func @transform_12(%arg0: i32) -> (i32, i32) {
    %c0_i32 = arith.constant 0 : i32
    %c0_i32_0 = arith.constant 0 : i32
    %c0_i32_1 = arith.constant 0 : i32
    return %c0_i32, %c0_i32_0 : i32, i32
  }
  func.func @transform_13(%arg0: i32) -> (i32, i32) {
    %c0_i32 = arith.constant 0 : i32
    %c0_i32_0 = arith.constant 0 : i32
    %c0_i32_1 = arith.constant 0 : i32
    return %c0_i32, %c0_i32_0 : i32, i32
  }
  func.func @transform_14(%arg0: i32) -> (i32, i32) {
    %c0_i32 = arith.constant 0 : i32
    %c0_i32_0 = arith.constant 0 : i32
    %c0_i32_1 = arith.constant 0 : i32
    return %c0_i32, %c0_i32_0 : i32, i32
  }
  func.func @transform_15(%arg0: i32) -> (i32, i32, i32) {
    %c0_i32 = arith.constant 0 : i32
    %c0_i32_0 = arith.constant 0 : i32
    %c0_i32_1 = arith.constant 0 : i32
    return %arg0, %c0_i32, %c0_i32_0 : i32, i32, i32
  }
}

</mosaic_0001>

<bundles_post_ra>
// kernel: tpu_custom_call.1
= control target key start
LH: loop header
LB: loop body
LE: loop exit
PB: predicated region body
PF: predicated region fallthrough
CT: control target
= control target key end

     0   :  { %s2603_s0 = inlined_call_operand.hbm [shape: f32[2,8,64], index: 0, kind: input, shape index: {}]   ;;  %s2604_s1 = inlined_call_operand.vmem [shape: f32[64,64], index: 1, kind: input, shape index: {}]   ;;  %s2605_s2 = inlined_call_operand.vmem [shape: f32[64,64], index: 2, kind: input, shape index: {}]   ;;  %s2606_s3 = inlined_call_operand.vmem [shape: f32[64,64], index: 3, kind: input, shape index: {}]   ;;  %s2607_s4 = inlined_call_operand.vmem [shape: f32[64,64], index: 4, kind: input, shape index: {}]   ;;  %s2608_s5 = inlined_call_operand.vmem [shape: f32[1,64], index: 5, kind: input, shape index: {}]   ;;  %s2609_s6 = inlined_call_operand.vmem [shape: f32[1,64], index: 6, kind: input, shape index: {}]   ;;  %s2610_s7 = inlined_call_operand.vmem [shape: f32[1,64], index: 7, kind: input, shape index: {}]   ;;  %s2611_s8 = inlined_call_operand.vmem [shape: f32[64,256], index: 8, kind: input, shape index: {}]   ;;  %s2612_s9 = inlined_call_operand.vmem [shape: f32[1,256], index: 9, kind: input, shape index: {}]   ;;  %s2613_s10 = inlined_call_operand.<no memory space> [shape: f32[1,1], index: 10, kind: input, shape index: {}]   ;;  %s2614_s11 = inlined_call_operand.vmem [shape: f32[256,64], index: 11, kind: input, shape index: {}]   ;;  %s2615_s12 = inlined_call_operand.vmem [shape: f32[1,64], index: 12, kind: input, shape index: {}]   ;;  %s2616_s13 = inlined_call_operand.vmem [shape: f32[1,64], index: 13, kind: input, shape index: {}]   ;;  %s2617_s14 = inlined_call_operand.vmem [shape: f32[1,64], index: 14, kind: input, shape index: {}]   ;;  %s2618_s15 = inlined_call_operand.hbm [shape: f32[2,8,64], index: 15, kind: output, shape index: {}]  }
   0x1   :  { %2625 = sst [smem:[#allocation13_spill]] %s2603_s0  ;;  %v20_v0 = vstv %s2613_s10 }
   0x2   :  { %2626 = sst [smem:[#allocation14_spill]] %s2618_s15  ;;  %21 = vst [vmem:[#allocation2] sm:$0x1] %v20_v0 }
   0x3   :  { %22 = vsyncpa [#allocation4], 0 }
   0x4   :  { %24 = vsyncpa [#allocation4 + $0x1], 0 }
   0x5   :  { %25 = vsyncpa [#allocation5], 0 }
   0x6   :  { %27 = vsyncpa [#allocation5 + $0x1], 0  ;;  %s2102_s20 = smov 0   ;;  %s2104_s21 = smov 0  }
   0x7   :  { %s2106_s22 = smov 0   ;;  %s2108_s23 = smov 0  }
   0x8 LB: > { %2627 = sst [smem:[#allocation9_spill]] %s1997_s20  ;;  %s2123_s10 = sadd.s32 4294967295, %s2009_s23   ;;  %s2009_s23 = sphi %s2108_s23, %s2644_s23   ;;  %s2005_s22 = sphi %s2106_s22, %s2646_s22   ;;  %s2001_s21 = sphi %s2104_s21, %s2648_s21   ;;  %s1997_s20 = sphi %s2102_s20, %s2647_s20  }
   0x9   : > { %2628 = sst [smem:[#allocation10_spill]] %s2005_s22  ;;  %s1546_s24 = sadd.s32 4294967294, %s2009_s23  }
   0xa   : > { %s2127_s25 = sadd.s32 1, %s2009_s23   ;;  %s40_s26 = sadd.s32 1, %s2005_s22 }
   0xb   : > { %2629 = sst [smem:[#allocation11_spill]] %s2127_s25  ;;  %s37_s27 = ssub.s32 %s2009_s23, %s2127_s25 }
   0xc   : > { %p47_p0 = scmp.ne.s32.totalorder %s2005_s22, %s2001_s21  ;;  %p38_p1 = scmp.eq.s32.totalorder %s37_s27, 0 }
   0xd   : > { %p48_p2 = scmp.eq.s32.totalorder %s2009_s23, 0  ;;  %p53_p3 = scmp.ne.s32.totalorder %s2001_s21, %s1997_s20 }
   0xe   : > { %p54_p4 = scmp.eq.s32.totalorder %s2123_s10, 0  ;;  %p371_p7 = scmp.eq.s32.totalorder %s2123_s10, 1 }
   0xf   : > { %s2139_s28 = scalar_select %p38_p1, %s2005_s22, %s40_s26  }
  0x10   : > { %p2141_p5 = por %p48_p2, %p47_p0  ;;  %p2145_p6 = por %p54_p4, %p53_p3 }
  0x11   : > { %2630 = sst [smem:[#allocation12_spill]] %s2139_s28  ;;  %p377_p8 = scmp.eq.s32.totalorder %s1546_s24, 1 }
  0x12   : > { %p1859_p10 = scmp.lt.s32.totalorder %s2009_s23, 2  ;;  %p2152_p11 = por %p371_p7, %p47_p0 }
  0x13   : > { %p2156_p12 = por %p377_p8, %p53_p3  ;;  %s439_s18 = sand.u32 1, %s2005_s22  }
  0x14   : > { %s2633_s16 = scalar_select %p2152_p11, 1, 0 }
  0x15   : > { %s2634_s17 = scalar_select %p2156_p12, 1, 0 }
  0x16   : > { %s1550_s19 = sshll.u32 %s2009_s23, 7  ;;  %s1549_s26 = sshll.u32 %s439_s18, 3 }
  0x17   : > { %s2635_s0 = sld [smem:[#allocation13_spill]]  ;;  %s443_s24 = scalar_lea.vmem [#allocation3], %s1549_s26 }
  0x18   : > { %s450_s20 = sshll.u32 %s443_s24, 4  ;;  %p2169_p13 = pnand %p1859_p10, %p2141_p5  ;;  %s2173_s20 = int_to_ptr.vmem [resolvable:$true] %s450_s20 }
  0x19   : > { %s440_s28 = scalar_lea.sflag [#allocation4], %s439_s18 }
  0x1a   : > { %p1915_p3 = pneg %p2169_p13 }
  0x1d   : > { %s2165_s25 = scalar_lea.hbm %s2635_s0, %s1550_s19  ;;  %s1918_s27 = scalar_lea.hbm %s2635_s0, 256 }
  0x1e   : > { %s1913_s19 = scalar_lea.hbm %s2165_s25, 128  ;;  %p1919_p5 = scmp.lt.u32.totalorder %s2165_s25, %s2635_s0 }
  0x1f   : > { %p1914_p2 = scmp.ne.s32.totalorder %s2165_s25, %s1913_s19  ;;  %p1920_p8 = scmp.lt.u32.totalorder %s1918_s27, %s1913_s19 }
  0x20   : > { %p1922_p9 = scmp.lt.u32.totalorder %s1913_s19, %s2165_s25 }
  0x21   : > { %p1916_p4 = pnand %p1915_p3, %p1914_p2  ;;  %p1921_p10 = por %p1920_p8, %p1919_p5 }
  0x23   : > { %p1917_p7 = pneg %p1916_p4  ;;  %p1923_p0 = por %p1922_p9, %p1921_p10 }
  0x25   : > { %p1924_p1 = pnand %p1923_p0, %p1917_p7 }
  0x27   : > { %1927 = shalt.err (!%p1924_p1)
}
  0x28   : > { %s1928_s18 = scalar_lea.vmem %s2173_s20, 128  ;;  %s2011_s29 = smov [#allocation3]  }
  0x29   : > { %p1929_p2 = scmp.ne.s32.totalorder %s2173_s20, %s1928_s18  ;;  %s1933_s26 = sshll.u32 %s2011_s29, 4  ;;  %s1934_s26 = int_to_ptr.vmem [resolvable:$false] %s1933_s26 }
  0x2a   : > { %s1935_s22 = scalar_lea.vmem %s1934_s26, 256  ;;  %p1936_p11 = scmp.lt.s32.totalorder %s2173_s20, %s1934_s26 }
  0x2b   : > { %p1931_p4 = pnand %p1929_p2, %p1915_p3  ;;  %p1937_p5 = scmp.lt.s32.totalorder %s1935_s22, %s1928_s18 }
  0x2d   : > { %p1932_p12 = pneg %p1931_p4  ;;  %p1938_p8 = por %p1937_p5, %p1936_p11 }
  0x2f   : > { %p1939_p9 = pnand %p1938_p8, %p1932_p12 }
  0x31   : > { %1942 = shalt.err (!%p1939_p9)
}
  0x32   : > { %1854 = dma.hbm_to_vmem [thread:$0]  (!%p2169_p13), %s2165_s25, 128, %s2173_s20, %s440_s28  }
  0x33   : > { %p2637_p0 = scmp.lt.s32.totalorder %s2009_s23, 3  ;;  %p2638_p1 = scmp.ge.s32.totalorder %s2009_s23, 1 }
  0x35   : > { %p456_p3 = pnand %p2638_p1, %p2637_p0 }
  0x36   : > { %s2207_s19 = sand.u32 (!%p456_p3), 1, %s2001_s21  }
  0x37   : > { %459 = sbr.rel (%p456_p3) target bundleno = 2990 (0xbae), region = 80  ;;  %s1552_s27 = sshll.u32 (!%p456_p3), %s2207_s19, 3 }
  0x38   : > { %s462_s24 = scalar_lea.sflag (!%p456_p3), [#allocation4], %s2207_s19  ;;  %s2213_s15 = scalar_lea.vmem (!%p456_p3), [#allocation3], %s1552_s27 }
  0x3e   : > { %1988 = dma.done.wait (%p2145_p6), %s462_s24, 128  }
  0x3f   : > { %1990 = vsyncadd (%p2145_p6), %s462_s24, 4294967168  ;;  %v2012_v1 = vmov 0.0|0.0   ;;  %vm2013_vm0 = vmmov 0   ;;  %v2014_v2 = vmov 0.0   ;;  %v513_v3 = vld [vmem:[%s2604_s1] sm:$0xff]  ;;  %v514_v4 = vld [vmem:[%s2604_s1 + $0x8] sm:$0xff] }
  0x40   : > { %1751 = vmatprep.subr.bf16.mxu1 %v2012_v1  ;;  %1671 = vmatprep.mubr.msk.f32.mxu1 %vm2013_vm0, %v2014_v2  ;;  %v515_v5 = vld [vmem:[%s2604_s1 + $0x10] sm:$0xff]  ;;  %v1752_v6 = vpack.c.bf16 %v514_v4, %v513_v3  ;;  %v516_v7 = vld [vmem:[%s2604_s1 + $0x18] sm:$0xff]  ;;  %v517_v9 = vld [vmem:[%s2604_s1 + $0x20] sm:$0xff]  ;;  %vm521_vm1 = vcmask 523264   ;;  %vm752_vm2 = vcmask 261120   ;;  %s2015_s18 = smov 96  }
  0x41   : > { %1775 = vmatprep.subr.bf16.mxu0 %v2012_v1  ;;  %1709 = vmatprep.mubr.msk.f32.mxu0 %vm2013_vm0, %v2014_v2  ;;  %v1755_v8 = vpack.c.bf16 %v516_v7, %v515_v5  ;;  %v518_v10 = vld [vmem:[%s2604_s1 + $0x28] sm:$0xff]  ;;  %v519_v12 = vld [vmem:[%s2604_s1 + $0x30] sm:$0xff]  ;;  %v520_v13 = vld [vmem:[%s2604_s1 + $0x38] sm:$0xff]  ;;  %vm829_vm3 = vcmask 64512   ;;  %s2016_s22 = smov 32   ;;  %s1573_s24 = sshll.u32 %s2123_s10, 7 }
  0x42   : > { %1753 = vmatpush3.bf16.msra.mxu1 %v1752_v6  ;;  %v1758_v11 = vpack.c.bf16 %v518_v10, %v517_v9  ;;  %v1761_v14 = vpack.c.bf16 %v520_v13, %v519_v12  ;;  %v596_v15 = vld [vmem:[%s2605_s2] sm:$0xff]  ;;  %v597_v16 = vld [vmem:[%s2605_s2 + $0x8] sm:$0xff]  ;;  %v598_v19 = vld [vmem:[%s2605_s2 + $0x10] sm:$0xff]  ;;  %s511_s20 = scalar_lea.vmem [#allocation6], %s1552_s27  ;;  %s2639_s30 = sld [smem:[#allocation14_spill]] }
  0x43   : > { %1754 = vmatprep.subr.bf16.mxu1 %v2012_v1  ;;  %v2259_v17 = vld [vmem:[%s2213_s15] sm:$0xff]  ;;  %v1764_v18 = vpack.c.bf16 %v597_v16, %v596_v15  ;;  %v599_v20 = vld [vmem:[%s2605_s2 + $0x18] sm:$0xff]  ;;  %s1476_s25 = sshll.u32 %s511_s20, 4  ;;  %s1463_s29 = scalar_lea.sflag [#allocation5], %s2207_s19  ;;  %s2560_s25 = int_to_ptr.vmem [resolvable:$true] %s1476_s25 }
  0x44   : > { %v1767_v21 = vpack.c.bf16 %v599_v20, %v598_v19  ;;  %v600_v22 = vld [vmem:[%s2605_s2 + $0x20] sm:$0xff]  ;;  %v601_v23 = vld [vmem:[%s2605_s2 + $0x28] sm:$0xff]  ;;  %v602_v25 = vld [vmem:[%s2605_s2 + $0x30] sm:$0xff]  ;;  %s1943_s15 = scalar_lea.vmem %s2560_s25, 128  ;;  %p2640_p11 = scmp.ne.s32.totalorder %s2633_s16, 0 }
  0x45   : > { %v1770_v24 = vpack.c.bf16 %v601_v23, %v600_v22  ;;  %v603_v26 = vld [vmem:[%s2605_s2 + $0x38] sm:$0xff]  ;;  %v674_v33 = vld [vmem:[%s2606_s3] sm:$0xff]  ;;  %v675_v34 = vld [vmem:[%s2606_s3 + $0x8] sm:$0xff]  ;;  %p1944_p6 = scmp.ne.s32.totalorder %s2560_s25, %s1943_s15  ;;  %s2018_s10 = smov [#allocation6]  }
  0x46   : > { %1756 = vmatpush3.bf16.msra.mxu1 %v1755_v8  ;;  %v1773_v27 = vpack.c.bf16 %v603_v26, %v602_v25  ;;  %v676_v35 = vld [vmem:[%s2606_s3 + $0x10] sm:$0xff]  ;;  %v1776_v36 = vpack.c.bf16 %v675_v34, %v674_v33  ;;  %v677_v37 = vld [vmem:[%s2606_s3 + $0x18] sm:$0xff]  ;;  %v678_v39 = vld [vmem:[%s2606_s3 + $0x20] sm:$0xff]  ;;  %s1947_s27 = sshll.u32 %s2018_s10, 4  ;;  %s1948_s27 = int_to_ptr.vmem [resolvable:$false] %s1947_s27 }
  0x47   : > { %1757 = vmatprep.subr.bf16.mxu1 %v2012_v1  ;;  %v1779_v38 = vpack.c.bf16 %v677_v37, %v676_v35  ;;  %v679_v40 = vld [vmem:[%s2606_s3 + $0x28] sm:$0xff]  ;;  %v680_v42 = vld [vmem:[%s2606_s3 + $0x30] sm:$0xff]  ;;  %v681_v43 = vld [vmem:[%s2606_s3 + $0x38] sm:$0xff]  ;;  %p1945_p12 = pnand %p1944_p6, %p2640_p11  ;;  %s1949_s26 = scalar_lea.vmem %s1948_s27, 256 }
  0x48   : > { %1777 = vmatpush3.bf16.msra.mxu0 %v1776_v36  ;;  %v1782_v41 = vpack.c.bf16 %v679_v40, %v678_v39  ;;  %v1785_v44 = vpack.c.bf16 %v681_v43, %v680_v42  ;;  %v1085_v12 = vld [vmem:[%s2607_s4] sm:$0xff]  ;;  %v1086_v13 = vld [vmem:[%s2607_s4 + $0x8] sm:$0xff]  ;;  %v1088_v16 = vld [vmem:[%s2607_s4 + $0x18] sm:$0xff]  ;;  %s2558_s0 = scalar_lea.hbm %s2639_s30, %s1573_s24  ;;  %p1950_p7 = scmp.lt.s32.totalorder %s2560_s25, %s1948_s27 }
  0x49   : > { %1778 = vmatprep.subr.bf16.mxu0 %v2012_v1  ;;  %v1788_v15 = vpack.c.bf16 %v1086_v13, %v1085_v12  ;;  %v1090_v19 = vld [vmem:[%s2607_s4 + $0x28] sm:$0xff]  ;;  %v1092_v22 = vld [vmem:[%s2607_s4 + $0x38] sm:$0xff]  ;;  %v1204_v40 = vld [vmem:[%s2611_s8] sm:$0xff]  ;;  %p1946_p13 = pneg %p1945_p12  ;;  %p1951_p10 = scmp.lt.s32.totalorder %s1949_s26, %s1943_s15 }
  0x4a   : > { %1759 = vmatpush3.bf16.msra.mxu1 %v1758_v11  ;;  %v1209_v43 = vld [vmem:[%s2611_s8 + $0x28] sm:$0xff]  ;;  %v1342_v12 = vld [vmem:[%s2614_s11 + $0xa0] sm:$0xff] }
  0x4b   : > { %1760 = vmatprep.subr.bf16.mxu1 %v2012_v1  ;;  %v1343_v13 = vld [vmem:[%s2614_s11 + $0xa8] sm:$0xff]  ;;  %p1952_p2 = por %p1951_p10, %p1950_p7 }
  0x4c   : > { %1780 = vmatpush3.bf16.msra.mxu0 %v1779_v38  ;;  %v1205_v38 = vld [vmem:[%s2611_s8 + $0x8] sm:$0xff] }
  0x4d   : > { %1781 = vmatprep.subr.bf16.mxu0 %v2012_v1  ;;  %p1953_p4 = pnand %p1952_p2, %p1946_p13 }
  0x4e   : > { %1762 = vmatpush3.bf16.msra.mxu1 %v1761_v14  ;;  %v1087_v14 = vld [vmem:[%s2607_s4 + $0x10] sm:$0xff] }
  0x4f   : > { %1763 = vmatprep.subr.bf16.mxu1 %v2012_v1 }
  0x50   : > { %1783 = vmatpush3.bf16.msra.mxu0 %v1782_v41  ;;  %v1206_v41 = vld [vmem:[%s2611_s8 + $0x10] sm:$0xff] }
  0x51   : > { %1672 = vmatmul.mubr.msk.f32.vlgmr.msra.gmra.mrb[0].mxu1 %vm521_vm1, %v2259_v17  ;;  %1784 = vmatprep.subr.bf16.mxu0 %v2012_v1  ;;  %v1801_v42 = vpack.c.bf16 %v1206_v41, %v1204_v40  ;;  %v1565_v40 = vld [vmem:[%s2609_s6] ss:$0 sm:$0xff] }
  0x52   : > { %1765 = vmatpush3.bf16.msra.mxu1 %v1764_v18  ;;  %1690 = vmatprep.mubr.msk.f32.mxu1 %vm2013_vm0, %v2014_v2  ;;  %v1791_v18 = vpack.c.bf16 %v1088_v16, %v1087_v14  ;;  %v1326_v16 = vld [vmem:[%s2614_s11 + $0x20] sm:$0xff] }
  0x53   : > { %1766 = vmatprep.subr.bf16.mxu1 %v2012_v1 }
  0x54   : > { %1786 = vmatpush3.bf16.msra.mxu0 %v1785_v44  ;;  %v1211_v44 = vld [vmem:[%s2611_s8 + $0x38] sm:$0xff] }
  0x55   : > { %1787 = vmatprep.subr.bf16.mxu0 %v2012_v1 }
  0x56   : > { %1768 = vmatpush3.bf16.msra.mxu1 %v1767_v21  ;;  %v1091_v21 = vld [vmem:[%s2607_s4 + $0x30] sm:$0xff] }
  0x57   : > { %1769 = vmatprep.subr.bf16.mxu1 %v2012_v1  ;;  %1710 = vmatmul.mubr.msk.f32.vlgmr.msra.gmra.mrb[0].mxu0 %vm521_vm1, %v2259_v17  ;;  %v1797_v23 = vpack.c.bf16 %v1092_v22, %v1091_v21  ;;  %v1328_v22 = vld [vmem:[%s2614_s11 + $0x30] sm:$0xff] }
  0x58   : > { %1748 = vmatprep.mubr.msk.f32.mxu0 %vm2013_vm0, %v2014_v2  ;;  %1789 = vmatpush3.bf16.msra.mxu0 %v1788_v15  ;;  %v1823_v15 = vpack.c.bf16 %v1343_v13, %v1342_v12 }
  0x59   : > { %1790 = vmatprep.subr.bf16.mxu0 %v2012_v1 }
  0x5a   : > { %1771 = vmatpush3.bf16.msra.mxu1 %v1770_v24 }
  0x5b   : > { %1772 = vmatprep.subr.bf16.mxu1 %v2012_v1 }
  0x5c   : > { %1792 = vmatpush3.bf16.msra.mxu0 %v1791_v18  ;;  %v1327_v18 = vld [vmem:[%s2614_s11 + $0x28] sm:$0xff] }
  0x5d   : > { %1793 = vmatprep.subr.bf16.mxu0 %v2012_v1 }
  0x5e   : > { %1774 = vmatpush3.bf16.msra.mxu1 %v1773_v27 }
  0x5f   : > { %1712 = vmatprep.subr.mxu1 %v2014_v2 }
  0x61   : > { %1691 = vmatmul.mubr.msk.f32.vlgmr.msra.gmra.mrb[2].mxu1 %vm521_vm1, %v2259_v17 }
  0x62   : > { %1714 = vmatprep.mubr.msk.f32.mxu1 %vm2013_vm0, %v2014_v2 }
 0x124   : > { %v591_v28 = vpop.f32.mrb[0].mxu1 }
 0x125   : > { %v1673_v29 = vpop.f32.mrb[1].mxu1  ;;  %v595_v32 = vmul.f32 0.17677669, %v591_v28  ;;  %v1563_v28 = vld [vmem:[%s2608_s5] ss:$0 sm:$0xff] }
 0x12a   : > { %v748_v53 = vpop.f32.mrb[0].mxu0 }
 0x12b   : > { %v1711_v54 = vpop.f32.mrb[1].mxu0 }
 0x134   : > { %v670_v30 = vpop.f32.mrb[2].mxu1 }
 0x135   : > { %916 = vrot.lane.b32.xlu1 %v670_v30, %s2015_s18  ;;  %v1692_v31 = vpop.f32.mrb[3].mxu1  ;;  %1713 = vmatpush3.xpose.msk.msra.mxu1 %vm752_vm2, %v670_v30 }
 0x136   : > { %1717 = vmatprep.subr.mxu1 %v2014_v2 }
 0x138   : > { %1715 = vmatmul.mubr.msk.f32.vlgmr.msra.gmra.mrb[4].mxu1 %vm752_vm2, %v595_v32 }
 0x139   : > { %914 = vrot.lane.b32.xlu1 %v595_v32, %s2015_s18  ;;  %1719 = vmatprep.mubr.msk.f32.mxu1 %vm2013_vm0, %v2014_v2 }
 0x13a   : > { %1718 = vmatpush3.msra.mxu1 %v748_v53 }
 0x13b   : > { %1722 = vmatprep.subr.mxu1 %v2014_v2 }
 0x1a7   : > { %v917_v57 = vpop.permute.xlu1 %916 }
 0x1ab   : > { %v915_v59 = vpop.permute.xlu1 %914 }
 0x20b   : > { %v825_v45 = vpop.f32.mrb[4].mxu1 }
 0x20c   : > { %v1716_v46 = vpop.f32.mrb[5].mxu1  ;;  %v830_v47 = vsel %vm829_vm3, %v825_v45, -inf }
 0x20d   : > { %831 = vmax.xlane.f32.xlu0 %v830_v47  ;;  %v1208_v46 = vld [vmem:[%s2611_s8 + $0x20] sm:$0xff]  ;;  %v1210_v47 = vld [vmem:[%s2611_s8 + $0x30] sm:$0xff] }
 0x29a   : > { %v832_v48 = vpop.xlane.xlu0 %831 }
 0x29b   : > { %v833_v49 = vsub.f32 %v825_v45, %v832_v48  ;;  %v1803_v45 = vpack.c.bf16 %v1211_v44, %v1209_v43  ;;  %v1805_v48 = vpack.c.bf16 %v1210_v47, %v1208_v46  ;;  %v1351_v46 = vld [vmem:[%s2614_s11 + $0xe8] sm:$0xff] }
 0x29d   : > { %v834_v50 = vmul.f32 1.442695, %v833_v49  ;;  %v1213_v49 = vld [vmem:[%s2611_s8 + $0x48] sm:$0xff] }
 0x29f   : > { %1901 = vpow2.f32 %v834_v50  ;;  %v1215_v50 = vld [vmem:[%s2611_s8 + $0x58] sm:$0xff] }
 0x2a9   : > { %v1902_v51 = vpop.eup %1901 }
 0x2aa   : > { %v836_v52 = vsel %vm829_vm3, %v1902_v51, 0.0 }
 0x2ab   : > { %837 = vadd.xlane.f32.xlu0 %v836_v52  ;;  %v1212_v52 = vld [vmem:[%s2611_s8 + $0x40] sm:$0xff] }
 0x338   : > { %v838_v55 = vpop.xlane.xlu0 %837 }
 0x339   : > { %1903 = vrcp.f32 %v838_v55  ;;  %v1217_v55 = vld [vmem:[%s2611_s8 + $0x68] sm:$0xff] }
 0x343   : > { %v1904_v56 = vpop.eup %1903 }
 0x344   : > { %v840_v58 = vmul.f32 %v1904_v56, %v1902_v51  ;;  %v1807_v51 = vpack.c.bf16 %v1215_v50, %v1213_v49  ;;  %v1219_v56 = vld [vmem:[%s2611_s8 + $0x78] sm:$0xff]  ;;  %v1352_v50 = vld [vmem:[%s2614_s11 + $0xf0] sm:$0xff] }
 0x346   : > { %1720 = vmatmul.mubr.msk.f32.vlgmr.msra.gmra.mrb[6].mxu1 %vm829_vm3, %v840_v58  ;;  %v1811_v58 = vpack.c.bf16 %v1219_v56, %v1217_v55  ;;  %v1222_v56 = vlaneseq }
 0x347   : > { %1723 = vmatpush3.xpose.msk.msra.mxu1 %vm752_vm2, %v917_v57  ;;  %1724 = vmatprep.mubr.msk.f32.mxu1 %vm2013_vm0, %v2014_v2  ;;  %v1216_v57 = vld [vmem:[%s2611_s8 + $0x60] sm:$0xff] }
 0x348   : > { %1727 = vmatprep.subr.mxu1 %v2014_v2 }
 0x34a   : > { %1725 = vmatmul.mubr.msk.f32.vlgmr.msra.gmra.mrb[8].mxu1 %vm752_vm2, %v915_v59  ;;  %v1218_v59 = vld [vmem:[%s2611_s8 + $0x70] sm:$0xff] }
 0x34b   : > { %1729 = vmatprep.mubr.msk.f32.mxu1 %vm2013_vm0, %v2014_v2 }
 0x419   : > { %v910_v60 = vpop.f32.mrb[6].mxu1 }
 0x41a   : > { %v1721_v61 = vpop.f32.mrb[7].mxu1 }
 0x41b   : > { %v1568_v61 = vld [vmem:[#allocation2] ss:$0 sm:$0xff] }
 0x41d   : > { %v988_v62 = vpop.f32.mrb[8].mxu1 }
 0x41e   : > { %v1726_v63 = vpop.f32.mrb[9].mxu1  ;;  %v992_v0 = vsel %vm829_vm3, %v988_v62, -inf }
 0x41f   : > { %993 = vmax.xlane.f32.xlu0 %v992_v0  ;;  %v1339_v63 = vld [vmem:[%s2614_s11 + $0x88] sm:$0xff]  ;;  %v2017_v0 = vmov 0  }
 0x420   : > { %1899 = vset.pattern.permute.xlu1 %v2017_v0  ;;  %1900 = vset.pattern.permute.xlu0 %v2017_v0 }
 0x435   : > { %1004 = vrot.lane.b32.xlu0 %v748_v53, %s2015_s18  ;;  %v1214_v53 = vld [vmem:[%s2611_s8 + $0x50] sm:$0xff] }
 0x436   : > { %v1809_v54 = vpack.c.bf16 %v1214_v53, %v1212_v52  ;;  %v1336_v53 = vld [vmem:[%s2614_s11 + $0x70] sm:$0xff] }
 0x4ac   : > { %v994_v3 = vpop.xlane.xlu0 %993 }
 0x4ad   : > { %v995_v4 = vsub.f32 %v988_v62, %v994_v3  ;;  %v1338_v62 = vld [vmem:[%s2614_s11 + $0x80] sm:$0xff] }
 0x4ae   : > { %v1815_v3 = vpack.c.bf16 %v1339_v63, %v1338_v62 }
 0x4af   : > { %v996_v5 = vmul.f32 1.442695, %v995_v4  ;;  %v1322_v4 = vld [vmem:[%s2614_s11] sm:$0xff] }
 0x4b0   : > { %v1005_v6 = vpop.permute.xlu0 %1004 }
 0x4b1   : > { %1905 = vpow2.f32 %v996_v5  ;;  %1728 = vmatpush3.msra.mxu1 %v1005_v6  ;;  %v1323_v5 = vld [vmem:[%s2614_s11 + $0x8] sm:$0xff]  ;;  %v1340_v6 = vld [vmem:[%s2614_s11 + $0x90] sm:$0xff] }
 0x4bb   : > { %v1906_v7 = vpop.eup %1905 }
 0x4bc   : > { %v998_v8 = vsel %vm829_vm3, %v1906_v7, 0.0 }
 0x4bd   : > { %999 = vadd.xlane.f32.xlu1 %v998_v8  ;;  %v1341_v8 = vld [vmem:[%s2614_s11 + $0x98] sm:$0xff] }
 0x54a   : > { %v1000_v9 = vpop.xlane.xlu1 %999 }
 0x54b   : > { %1907 = vrcp.f32 %v1000_v9  ;;  %v1324_v9 = vld [vmem:[%s2614_s11 + $0x10] sm:$0xff] }
 0x555   : > { %v1908_v10 = vpop.eup %1907 }
 0x556   : > { %v1002_v11 = vmul.f32 %v1908_v10, %v1906_v7  ;;  %v1817_v7 = vpack.c.bf16 %v1323_v5, %v1322_v4  ;;  %v1325_v10 = vld [vmem:[%s2614_s11 + $0x18] sm:$0xff] }
 0x557   : > { %v1821_v14 = vpack.c.bf16 %v1325_v10, %v1324_v9 }
 0x558   : > { %1730 = vmatmul.mubr.msk.f32.vlgmr.msra.gmra.mrb[10].mxu1 %vm829_vm3, %v1002_v11  ;;  %v1819_v11 = vpack.c.bf16 %v1341_v8, %v1340_v6 }
 0x559   : > { %1299 = vmatprep.mubr.f32.mxu1 %v2014_v2  ;;  %v1089_v2 = vld [vmem:[%s2607_s4 + $0x20] sm:$0xff] }
 0x55a   : > { %v1794_v20 = vpack.c.bf16 %v1090_v19, %v1089_v2  ;;  %v1344_v2 = vld [vmem:[%s2614_s11 + $0xb0] sm:$0xff]  ;;  %v1345_v19 = vld [vmem:[%s2614_s11 + $0xb8] sm:$0xff] }
 0x55b   : > { %v1827_v21 = vpack.c.bf16 %v1345_v19, %v1344_v2 }
 0x55c   : > { %1795 = vmatpush3.bf16.msra.mxu0 %v1794_v20  ;;  %v1825_v20 = vpack.c.bf16 %v1327_v18, %v1326_v16 }
 0x55d   : > { %1796 = vmatprep.subr.bf16.mxu0 %v2012_v1 }
 0x560   : > { %1798 = vmatpush3.bf16.msra.mxu0 %v1797_v23  ;;  %v1329_v23 = vld [vmem:[%s2614_s11 + $0x38] sm:$0xff] }
 0x561   : > { %1816 = vmatprep.subr.bf16.mxu0 %v1815_v3 }
 0x62b   : > { %v1076_v24 = vpop.f32.mrb[10].mxu1 }
 0x62c   : > { %1081 = vrot.lane.b32.xlu0 %v1076_v24, %s2016_s22  ;;  %v1731_v25 = vpop.f32.mrb[11].mxu1  ;;  %v1346_v24 = vld [vmem:[%s2614_s11 + $0xc0] sm:$0xff] }
 0x62d   : > { %v1347_v25 = vld [vmem:[%s2614_s11 + $0xc8] sm:$0xff] }
 0x69e   : > { %v1082_v26 = vpop.permute.xlu0 %1081 }
 0x69f   : > { %v1084_v27 = vsel %vm752_vm2, %v910_v60, %v1082_v26  ;;  %v1813_v60 = vpack.c.bf16 %v1218_v59, %v1216_v57  ;;  %v1829_v26 = vpack.c.bf16 %v1329_v23, %v1328_v22  ;;  %v1223_v57 = vshrl.u32 %v1222_v56, 7  ;;  %v1220_v59 = vld [vmem:[%s2612_s9] sm:$0x3] }
 0x6a0   : > { %1749 = vmatmul.mubr.msk.f32.vlgmr.msra.gmra.mrb[2].mxu0 %vm521_vm1, %v1084_v27  ;;  %v1831_v27 = vpack.c.bf16 %v1347_v25, %v1346_v24 }
 0x6a1   : > { %1818 = vmatpush3.bf16.msra.mxu0 %v1817_v7 }
 0x6a2   : > { %1820 = vmatprep.subr.bf16.mxu0 %v1819_v11  ;;  %v1569_v11 = vld [vmem:[%s2615_s12] ss:$0 sm:$0xff] }
 0x6a5   : > { %1822 = vmatpush3.bf16.msra.mxu0 %v1821_v14 }
 0x6a6   : > { %1824 = vmatprep.subr.bf16.mxu0 %v1823_v15 }
 0x6a9   : > { %1826 = vmatpush3.bf16.msra.mxu0 %v1825_v20 }
 0x6aa   : > { %1828 = vmatprep.subr.bf16.mxu0 %v1827_v21 }
 0x6ad   : > { %1830 = vmatpush3.bf16.msra.mxu0 %v1829_v26  ;;  %v1570_v26 = vld [vmem:[%s2616_s13] ss:$0 sm:$0xff] }
 0x6ae   : > { %1832 = vmatprep.subr.bf16.mxu0 %v1831_v27 }
 0x773   : > { %v1169_v29 = vpop.f32.mrb[2].mxu0 }
 0x774   : > { %v1170_v30 = vadd.f32 %v1563_v28, %v1169_v29  ;;  %v1750_v31 = vpop.f32.mrb[3].mxu0  ;;  %v1330_v28 = vld [vmem:[%s2614_s11 + $0x40] sm:$0xff]  ;;  %v1331_v29 = vld [vmem:[%s2614_s11 + $0x48] sm:$0xff] }
 0x775   : > { %v1349_v31 = vld [vmem:[%s2614_s11 + $0xd8] sm:$0xff] }
 0x776   : > { %v1173_v32 = vadd.f32 %v1170_v30, %v2259_v17  ;;  %v1207_v17 = vld [vmem:[%s2611_s8 + $0x18] sm:$0xff]  ;;  %v1348_v30 = vld [vmem:[%s2614_s11 + $0xd0] sm:$0xff] }
 0x777   : > { %v1799_v39 = vpack.c.bf16 %v1207_v17, %v1205_v38 }
 0x778   : > { %v1176_v1 = vsel %vm521_vm1, %v1173_v32, 0.0 }
 0x779   : > { %1177 = vadd.xlane.f32.xlu0 %v1176_v1  ;;  %1800 = vmatprep.subr.bf16.mxu1 %v1799_v39  ;;  %v1835_v1 = vpack.c.bf16 %v1349_v31, %v1348_v30 }
 0x77a   : > { %1802 = vmatpush1.bf16.msra.mxu1 %v1801_v42  ;;  %v1566_v42 = vld [vmem:[%s2610_s7] ss:$0 sm:$0xff] }
 0x77b   : > { %1804 = vmatprep.subr.bf16.mxu1 %v1803_v45  ;;  %v1350_v45 = vld [vmem:[%s2614_s11 + $0xe0] sm:$0xff] }
 0x77c   : > { %v1839_v47 = vpack.c.bf16 %v1351_v46, %v1350_v45 }
 0x77e   : > { %1806 = vmatpush1.bf16.msra.mxu1 %v1805_v48  ;;  %v1335_v48 = vld [vmem:[%s2614_s11 + $0x68] sm:$0xff] }
 0x77f   : > { %1808 = vmatprep.subr.bf16.mxu1 %v1807_v51  ;;  %v1353_v51 = vld [vmem:[%s2614_s11 + $0xf8] sm:$0xff] }
 0x780   : > { %v1843_v52 = vpack.c.bf16 %v1353_v51, %v1352_v50 }
 0x782   : > { %1810 = vmatpush1.bf16.msra.mxu1 %v1809_v54  ;;  %v1337_v54 = vld [vmem:[%s2614_s11 + $0x78] sm:$0xff] }
 0x783   : > { %1812 = vmatprep.subr.bf16.mxu1 %v1811_v58  ;;  %v1845_v55 = vpack.c.bf16 %v1337_v54, %v1336_v53  ;;  %v1224_v58 = vsub.s32 0, %v1223_v57 }
 0x786   : > { %1814 = vmatpush1.bf16.msra.mxu1 %v1813_v60  ;;  %v1228_v60 = vsub.s32 1, %v1223_v57 }
 0x788   : > { %v1229_v62 = vrot.slane %v1220_v59, %v1228_v60 }
 0x806   : > { %v1178_v33 = vpop.xlane.xlu0 %1177 }
 0x807   : > { %v1180_v34 = vmul.f32 0.015625, %v1178_v33  ;;  %v1332_v33 = vld [vmem:[%s2614_s11 + $0x50] sm:$0xff] }
 0x809   : > { %v2381_v35 = vsub.f32 %v1173_v32, %v1180_v34  ;;  %v1833_v32 = vpack.c.bf16 %v1331_v29, %v1330_v28  ;;  %v1333_v34 = vld [vmem:[%s2614_s11 + $0x58] sm:$0xff]  ;;  %v1571_v28 = vld [vmem:[%s2617_s14] ss:$0 sm:$0xff] }
 0x80b   : > { %v1182_v36 = vmul.f32 %v2381_v35, %v2381_v35  ;;  %1834 = vmatpush3.bf16.msra.mxu0 %v1833_v32 }
 0x80c   : > { %1836 = vmatprep.subr.bf16.mxu0 %v1835_v1 }
 0x80d   : > { %v1183_v37 = vsel %vm521_vm1, %v1182_v36, 0.0  ;;  %v1837_v36 = vpack.c.bf16 %v1333_v34, %v1332_v33 }
 0x80e   : > { %1184 = vadd.xlane.f32.xlu1 %v1183_v37 }
 0x80f   : > { %1838 = vmatpush3.bf16.msra.mxu0 %v1837_v36 }
 0x810   : > { %1840 = vmatprep.subr.bf16.mxu0 %v1839_v47 }
 0x81f   : > { %1315 = vperm.xlu1 %1899, %v1568_v61   ;;  %v1225_v61 = vrot.slane %v1220_v59, %v1224_v58 }
 0x89b   : > { %v1185_v37 = vpop.xlane.xlu1 %1184 }
 0x89c   : > { %v1186_v38 = vmul.f32 0.015625, %v1185_v37 }
 0x89e   : > { %v1187_v17 = vadd.f32 1e-05, %v1186_v38 }
 0x89f   : > { %v1316_v0 = vpop.permute.xlu1 %1315 }
 0x8a0   : > { %1909 = vrsqrt.f32 %v1187_v17 }
 0x8aa   : > { %v1910_v39 = vpop.eup %1909 }
 0x8ab   : > { %v1189_v41 = vmul.f32 %v1910_v39, %v2381_v35  ;;  %v1334_v35 = vld [vmem:[%s2614_s11 + $0x60] sm:$0xff] }
 0x8ac   : > { %v1841_v49 = vpack.c.bf16 %v1335_v48, %v1334_v35 }
 0x8ad   : > { %v1196_v43 = vmul.f32 %v1565_v40, %v1189_v41 }
 0x8ae   : > { %1842 = vmatpush3.bf16.msra.mxu0 %v1841_v49 }
 0x8af   : > { %v1203_v44 = vadd.f32 %v1566_v42, %v1196_v43  ;;  %1844 = vmatprep.subr.bf16.mxu0 %v1843_v52 }
 0x8b1   : > { %1567 = vmatmul.mubr.msk.f32.vlgmr.msra.gmra.mrb[12].mxu1 %vm521_vm1, %v1203_v44 }
 0x8b2   : > { %1846 = vmatpush3.bf16.msra.mxu0 %v1845_v55 }
 0x984   : > { %v1301_v63 = vpop.f32.mrb[12].mxu1 }
 0x985   : > { %v1302_v3 = vadd.f32 %v1301_v63, %v1225_v61  ;;  %v1303_v4 = vpop.f32.mrb[13].mxu1 }
 0x986   : > { %v1304_v5 = vadd.f32 %v1303_v4, %v1229_v62 }
 0x987   : > { %v1318_v6 = vmul.f32 %v1316_v0, %v1302_v3  ;;  %vm1306_vm4 = vcmp.ge.f32.partialorder %v1302_v3, 0.0 }
 0x988   : > { %v1319_v7 = vmul.f32 %v1316_v0, %v1304_v5  ;;  %vm1307_vm5 = vcmp.ge.f32.partialorder %v1304_v5, 0.0 }
 0x989   : > { %v1320_v9 = vsel %vm1306_vm4, %v1302_v3, %v1318_v6 }
 0x98a   : > { %v1321_v8 = vsel %vm1307_vm5, %v1304_v5, %v1319_v7 }
 0x98b   : > { %1425 = vmatprep.mubr.f32.mxu0 %v1321_v8 }
 0x98c   : > { %1426 = vmatmul.mubr.f32.vlgmr.msra.gmra.mrb[4].mxu0 %v1320_v9 }
 0xa5f   : > { %v1652_v10 = vpop.f32.mrb[4].mxu0 }
 0xa60   : > { %v1653_v12 = vpop.f32.mrb[5].mxu0 }
 0xa61   : > { %v1654_v13 = vadd.f32 %v1653_v12, %v1652_v10 }
 0xa63   : > { %v1428_v14 = vadd.f32 %v1654_v13, %v1569_v11 }
 0xa65   : > { %v1431_v15 = vadd.f32 %v1428_v14, %v1203_v44 }
 0xa67   : > { %v1434_v16 = vsel %vm521_vm1, %v1431_v15, 0.0 }
 0xa68   : > { %1435 = vadd.xlane.f32.xlu1 %v1434_v16 }
 0xaf5   : > { %v1436_v18 = vpop.xlane.xlu1 %1435 }
 0xaf6   : > { %v1437_v2 = vmul.f32 0.015625, %v1436_v18 }
 0xaf8   : > { %v1438_v19 = vsub.f32 %v1431_v15, %v1437_v2 }
 0xafa   : > { %v1439_v20 = vmul.f32 %v1438_v19, %v1438_v19 }
 0xafc   : > { %v1440_v21 = vsel %vm521_vm1, %v1439_v20, 0.0 }
 0xafd   : > { %1441 = vadd.xlane.f32.xlu0 %v1440_v21 }
 0xb8a   : > { %v1442_v22 = vpop.xlane.xlu0 %1441 }
 0xb8b   : > { %v1443_v23 = vmul.f32 0.015625, %v1442_v22 }
 0xb8d   : > { %v1444_v24 = vadd.f32 1e-05, %v1443_v23 }
 0xb8f   : > { %1911 = vrsqrt.f32 %v1444_v24 }
 0xb99   : > { %v1912_v25 = vpop.eup %1911 }
 0xb9a   : > { %v1446_v27 = vmul.f32 %v1912_v25, %v1438_v19 }
 0xb9c   : > { %v1453_v29 = vmul.f32 %v1570_v26, %v1446_v27 }
 0xb9e   : > { %v1460_v30 = vadd.f32 %v1571_v28, %v1453_v29 }
 0xba0   : > { %1461 = vst.msk [vmem:[%s511_s20] sm:$0xff] %vm521_vm1, %v1460_v30 }
 0xba1   : > { %1956 = shalt.err (!%p1953_p4)
}
 0xba2   : > { %s1957_s19 = scalar_lea.hbm %s2558_s0, 128  ;;  %s1961_s20 = scalar_lea.hbm %s2639_s30, 256 }
 0xba3   : > { %p1958_p5 = scmp.ne.s32.totalorder %s2558_s0, %s1957_s19  ;;  %p1962_p0 = scmp.lt.u32.totalorder %s2558_s0, %s2639_s30 }
 0xba4   : > { %p1963_p1 = scmp.lt.u32.totalorder %s1961_s20, %s1957_s19  ;;  %p1965_p6 = scmp.lt.u32.totalorder %s1957_s19, %s2558_s0 }
 0xba5   : > { %p1959_p8 = pnand %p1958_p5, %p2640_p11 }
 0xba6   : > { %p1964_p3 = por %p1963_p1, %p1962_p0 }
 0xba7   : > { %p1960_p9 = pneg %p1959_p8 }
 0xba8   : > { %p1966_p12 = por %p1965_p6, %p1964_p3 }
 0xbaa   : > { %p1967_p13 = pnand %p1966_p12, %p1960_p9 }
 0xbac   : > { %1970 = shalt.err (!%p1967_p13)
}
 0xbad   : > { %1849 = dma.vmem_to_hbm [thread:$0]  (%p2640_p11), %s2560_s25, 128, %s2558_s0, %s1463_s29  }
 0xbae PF: > { %s2641_s15 = sld [smem:[#allocation9_spill]]  ;;  %p2642_p7 = scmp.ne.s32.totalorder %s2634_s17, 0 }
 0xbaf   : > { %p2643_p10 = scmp.ge.s32.totalorder %s2009_s23, 2 }
 0xbb1   : > { %p1856_p2 = pnand %p2643_p10, %p2642_p7 }
 0xbb4   : > { %s1488_s10 = sand.u32 1, %s2641_s15  }
 0xbb5   : > { %s1489_s27 = scalar_lea.sflag [#allocation5], %s1488_s10 }
 0xbb6   : > { %1992 = dma.done.wait (!%p1856_p2), %s1489_s27, 128  }
 0xbb7   : > { %1994 = vsyncadd (!%p1856_p2), %s1489_s27, 4294967168  ;;  %s2644_s23 = sld [smem:[#allocation11_spill]]  ;;  %s2645_s26 = sld [smem:[#allocation10_spill]] }
 0xbb8   : > { %s2646_s22 = sld [smem:[#allocation12_spill]]  ;;  %s2647_s20 = smov %s2001_s21 }
 0xbbd   : > { %p30_p4 = scmp.ge.s32.totalorder %s2644_s23, 4   ;;  %s2648_s21 = smov %s2645_s26 }
 0xbbf   :  { %32 = sbr.rel (!%p30_p4) target bundleno = 8 (0x8), region = 125 }
 0xbc6   :  { %1494 = vsyncpa [#allocation4], 1 }
 0xbc7   :  { %1496 = vsyncpa [#allocation4 + $0x1], 1 }
 0xbc8   :  { %1497 = vsyncpa [#allocation5], 1 }
 0xbc9   :  { %1499 = vsyncpa [#allocation5 + $0x1], 1 }

</bundles_post_ra>
